<compile_context>
chip_gen: v6e
topology: v6e:2x2x1
jax: 0.10.0
libtpu: 0.0.40
codegen_flags: <defaults>
</compile_context>

<pallas_src>
import jax
import jax.numpy as jnp
from jax.experimental import pallas as pl
from jax.experimental.pallas import tpu as pltpu

# Small, module-consistent shapes.
B, T, IDIM, NCHANS, K = 2, 8, 16, 32, 3      # batch, seq, idim, n_chans, kernel_size
BT = B * T
LN_EPS = 1e-12

W1_ROWS = K * IDIM                 # 48   rows of the im2col'd conv-1 weight
W2_ROWS = K * NCHANS               # 96   rows of the im2col'd conv-2 weight
HEAD_ROW0 = W1_ROWS + W2_ROWS      # 144  first row of the fused head weight


def duration_predictor_kernel(x_ref, mask_ref, w_ref, p_ref, out_ref):
    """Fused (Conv1d SAME -> ReLU -> LayerNorm -> mask) x2 -> fused linear heads.

    x_ref:    (B*T, IDIM)     activations, rows ordered b*T + t
    mask_ref: (B*T, 1)        non-padding mask (float)
    w_ref:    (176, NCHANS)   [w1 (48) | w2 (96) | head weight (32, cols 0:2 used)]
    p_ref:    (7, NCHANS)     [b1, g1, be1, b2, g2, be2, head bias (cols 0:2 used)]
    out_ref:  (B*T, 2)        col 0 = werdur, col 1 = to_be_edited
    """
    x = x_ref[...]
    mask = mask_ref[...]                      # hoisted; reused by both blocks + heads
    w_all = w_ref[...]
    p_all = p_ref[...]

    # Sequence-edge masks for the rolled neighbour taps (replaces SAME zero-pad:
    # the cyclic roll wraps across batch/sequence boundaries, so zero those rows).
    t_idx = jax.lax.broadcasted_iota(jnp.int32, (BT, 1), 0) % T
    left_ok = (t_idx > 0).astype(jnp.float32)         # x[t-1] exists
    right_ok = (t_idx < T - 1).astype(jnp.float32)    # x[t+1] exists

    def conv_relu_ln(h, w, b, gamma, beta):
        # Neighbour taps via XLU rotation; build the im2col slab once and issue
        # a single matmul instead of K per-tap matmuls.
        prev_h = pltpu.roll(h, shift=1, axis=0) * left_ok        # h[t-1]
        next_h = pltpu.roll(h, shift=BT - 1, axis=0) * right_ok  # h[t+1]
        slab = jnp.concatenate([prev_h, h, next_h], axis=-1)     # (BT, K*Cin)
        y = jnp.dot(slab, w, preferred_element_type=jnp.float32) + b
        y = jnp.maximum(y, 0.0)                                  # ReLU

        # LayerNorm over channels (torch: biased variance, eps=1e-12).
        # Single pass: mean and E[y^2] are independent reductions; clamp var.
        mean = jnp.mean(y, axis=-1, keepdims=True)
        ex2 = jnp.mean(y * y, axis=-1, keepdims=True)
        var = jnp.maximum(ex2 - mean * mean, 0.0)
        y = (y - mean) * jax.lax.rsqrt(var + LN_EPS) * gamma + beta

        # FairseqDropout: identity at inference; mask padded rows.
        return y * mask

    h = conv_relu_ln(x, w_all[0:W1_ROWS], p_all[0:1], p_all[1:2], p_all[2:3])
    h = conv_relu_ln(h, w_all[W1_ROWS:HEAD_ROW0], p_all[3:4], p_all[4:5], p_all[5:6])

    # Fused werdur/edit heads: one matmul, one store (padded cols are zero).
    out = jnp.dot(h, w_all[HEAD_ROW0:], preferred_element_type=jnp.float32) + p_all[6:7]
    out = out * mask
    out_ref[...] = out[:, 0:2]


def pack_params(params):
    """Host/XLA-side packing of the 12 small tensors into 2 slabs."""
    (w1, b1, g1, be1, w2, b2, g2, be2, ww, wb, ew, eb) = params
    head_w = jnp.pad(jnp.concatenate([ww, ew], axis=1), ((0, 0), (0, NCHANS - 2)))
    head_b = jnp.pad(jnp.concatenate([wb, eb], axis=1), ((0, 0), (0, NCHANS - 2)))
    w_slab = jnp.concatenate(
        [w1.reshape(W1_ROWS, NCHANS),          # tap-major rows: [k0|k1|k2] x Cin
         w2.reshape(W2_ROWS, NCHANS),
         head_w], axis=0)                      # (176, NCHANS)
    p_slab = jnp.concatenate([b1, g1, be1, b2, g2, be2, head_b], axis=0)  # (7, NCHANS)
    return w_slab, p_slab


def duration_predictor(xs, nonpad, params):
    w_slab, p_slab = pack_params(params)
    xs2 = xs.reshape(BT, IDIM)
    mask2 = nonpad.reshape(BT, 1).astype(jnp.float32)

    vmem = pl.BlockSpec(memory_space=pltpu.MemorySpace.VMEM)
    out = pl.pallas_call(
        duration_predictor_kernel,
        out_shape=jax.ShapeDtypeStruct((BT, 2), jnp.float32),
        in_specs=[vmem, vmem, vmem, vmem],
        out_specs=vmem,
    )(xs2, mask2, w_slab, p_slab)

    out = out.reshape(B, T, 2)
    return out[:, :, 0:1], out[:, :, 1:2]


def reference(xs, nonpad, params):
    """Pure-JAX mirror of the PyTorch forward (channels-last)."""
    (w1, b1, g1, be1, w2, b2, g2, be2, ww, wb, ew, eb) = params

    def conv_block(x, w, b, gamma, beta):
        pad = K // 2
        xp = jnp.pad(x, ((0, 0), (pad, pad), (0, 0)))
        y = sum(jnp.einsum('btd,dc->btc', xp[:, k:k + T, :], w[k]) for k in range(K)) + b
        y = jnp.maximum(y, 0.0)
        mean = jnp.mean(y, axis=-1, keepdims=True)
        var = jnp.mean((y - mean) ** 2, axis=-1, keepdims=True)
        y = (y - mean) / jnp.sqrt(var + LN_EPS) * gamma + beta
        return y * nonpad[:, :, None]

    h = conv_block(xs, w1, b1, g1, be1)
    h = conv_block(h, w2, b2, g2, be2)
    werdur = (h @ ww + wb) * nonpad[:, :, None]
    edit = (h @ ew + eb) * nonpad[:, :, None]
    return werdur, edit


if __name__ == "__main__":
    key = jax.random.PRNGKey(0)
    ks = jax.random.split(key, 16)

    xs = jax.random.normal(ks[0], (B, T, IDIM), dtype=jnp.float32)
    lengths = jnp.array([T, T - 3], dtype=jnp.int32)
    nonpad = (jnp.arange(T)[None, :] < lengths[:, None]).astype(jnp.float32)  # (B, T)

    s = 0.1
    # Conv layer 1: torch weight (Cout, Cin, K) -> stored here as (K, Cin, Cout)
    w1 = jax.random.normal(ks[1], (K, IDIM, NCHANS), dtype=jnp.float32) * s
    b1 = jax.random.normal(ks[2], (1, NCHANS), dtype=jnp.float32) * s
    g1 = 1.0 + jax.random.normal(ks[3], (1, NCHANS), dtype=jnp.float32) * s
    be1 = jax.random.normal(ks[4], (1, NCHANS), dtype=jnp.float32) * s
    # Conv layer 2
    w2 = jax.random.normal(ks[5], (K, NCHANS, NCHANS), dtype=jnp.float32) * s
    b2 = jax.random.normal(ks[6], (1, NCHANS), dtype=jnp.float32) * s
    g2 = 1.0 + jax.random.normal(ks[7], (1, NCHANS), dtype=jnp.float32) * s
    be2 = jax.random.normal(ks[8], (1, NCHANS), dtype=jnp.float32) * s
    # werdur_linear / edit_linear: torch (1, C) -> stored as (C, 1)
    ww = jax.random.normal(ks[9], (NCHANS, 1), dtype=jnp.float32) * s
    wb = jax.random.normal(ks[10], (1, 1), dtype=jnp.float32) * s
    ew = jax.random.normal(ks[11], (NCHANS, 1), dtype=jnp.float32) * s
    eb = jax.random.normal(ks[12], (1, 1), dtype=jnp.float32) * s

    params = (w1, b1, g1, be1, w2, b2, g2, be2, ww, wb, ew, eb)

    werdur, to_be_edited = duration_predictor(xs, nonpad, params)
    jax.block_until_ready((werdur, to_be_edited))

    werdur_ref, edit_ref = reference(xs, nonpad, params)
    assert werdur.shape == (B, T, 1) and to_be_edited.shape == (B, T, 1)
    assert jnp.allclose(werdur, werdur_ref, atol=1e-4, rtol=1e-4)
    assert jnp.allclose(to_be_edited, edit_ref, atol=1e-4, rtol=1e-4)

    print("KERNEL_OK")
</pallas_src>

<mosaic_0001>
module attributes {stable_mosaic.version = 11 : i64} {
  func.func @duration_predictor_kernel(%arg0: memref<16x16xf32, #tpu.memory_space<vmem>>, %arg1: memref<16x1xf32, #tpu.memory_space<vmem>>, %arg2: memref<176x32xf32, #tpu.memory_space<vmem>>, %arg3: memref<7x32xf32, #tpu.memory_space<vmem>>, %arg4: memref<16x2xf32, #tpu.memory_space<vmem>>) attributes {dimension_semantics = [], scalar_prefetch = 0 : i64, scratch_operands = 0 : i64, tpu.core_type = #tpu.core_type<tc>} {
    %c0 = arith.constant 0 : index
    %c0_0 = arith.constant 0 : index
    %0 = vector.load %arg0[%c0, %c0_0] : memref<16x16xf32, #tpu.memory_space<vmem>>, vector<16x16xf32>
    %c0_1 = arith.constant 0 : index
    %c0_2 = arith.constant 0 : index
    %1 = vector.load %arg1[%c0_1, %c0_2] : memref<16x1xf32, #tpu.memory_space<vmem>>, vector<16x1xf32>
    %c0_3 = arith.constant 0 : index
    %c0_4 = arith.constant 0 : index
    %2 = vector.load %arg2[%c0_3, %c0_4] : memref<176x32xf32, #tpu.memory_space<vmem>>, vector<176x32xf32>
    %c0_5 = arith.constant 0 : index
    %c0_6 = arith.constant 0 : index
    %3 = vector.load %arg3[%c0_5, %c0_6] : memref<7x32xf32, #tpu.memory_space<vmem>>, vector<7x32xf32>
    %4 = tpu.iota {dimensions = array<i32: 0>} : vector<16x1xi32>
    %c8_i32 = arith.constant 8 : i32
    %c0_i32 = arith.constant 0 : i32
    %5 = arith.cmpi eq, %c8_i32, %c0_i32 : i32
    %c1_i32 = arith.constant 1 : i32
    %6 = arith.select %5, %c1_i32, %c8_i32 : i32
    %7 = vector.broadcast %6 : i32 to vector<16x1xi32>
    %8 = arith.remsi %4, %7 : vector<16x1xi32>
    %c0_i32_7 = arith.constant 0 : i32
    %9 = vector.broadcast %c0_i32_7 : i32 to vector<16x1xi32>
    %10 = arith.cmpi ne, %8, %9 : vector<16x1xi32>
    %c0_i32_8 = arith.constant 0 : i32
    %11 = vector.broadcast %c0_i32_8 : i32 to vector<16x1xi32>
    %12 = arith.cmpi slt, %8, %11 : vector<16x1xi32>
    %c0_i32_9 = arith.constant 0 : i32
    %13 = arith.cmpi slt, %6, %c0_i32_9 : i32
    %14 = vector.broadcast %13 : i1 to vector<16x1xi1>
    %15 = vector.broadcast %14 : vector<16x1xi1> to vector<16x1xi1>
    %16 = arith.xori %12, %15 : vector<16x1xi1>
    %17 = arith.andi %16, %10 : vector<16x1xi1>
    %18 = vector.broadcast %6 : i32 to vector<16x1xi32>
    %19 = arith.addi %8, %18 : vector<16x1xi32>
    %20 = arith.select %17, %19, %8 : vector<16x1xi1>, vector<16x1xi32>
    %c0_i32_10 = arith.constant 0 : i32
    %21 = vector.broadcast %c0_i32_10 : i32 to vector<16x1xi32>
    %22 = arith.cmpi sgt, %20, %21 : vector<16x1xi32>
    %23 = arith.extui %22 : vector<16x1xi1> to vector<16x1xi32>
    %24 = arith.sitofp %23 : vector<16x1xi32> to vector<16x1xf32>
    %c7_i32 = arith.constant 7 : i32
    %25 = vector.broadcast %c7_i32 : i32 to vector<16x1xi32>
    %26 = arith.cmpi slt, %20, %25 : vector<16x1xi32>
    %27 = arith.extui %26 : vector<16x1xi1> to vector<16x1xi32>
    %28 = arith.sitofp %27 : vector<16x1xi32> to vector<16x1xf32>
    %29 = vector.extract_strided_slice %2 {offsets = [0, 0], sizes = [48, 32], strides = [1, 1]} : vector<176x32xf32> to vector<48x32xf32>
    %30 = vector.extract_strided_slice %3 {offsets = [0, 0], sizes = [1, 32], strides = [1, 1]} : vector<7x32xf32> to vector<1x32xf32>
    %31 = vector.extract_strided_slice %3 {offsets = [1, 0], sizes = [1, 32], strides = [1, 1]} : vector<7x32xf32> to vector<1x32xf32>
    %32 = vector.extract_strided_slice %3 {offsets = [2, 0], sizes = [1, 32], strides = [1, 1]} : vector<7x32xf32> to vector<1x32xf32>
    %c1_i32_11 = arith.constant 1 : i32
    %33 = tpu.dynamic_rotate %0 by %c1_i32_11 dim 0 : vector<16x16xf32>, i32 -> vector<16x16xf32>
    %34 = vector.broadcast %24 : vector<16x1xf32> to vector<16x16xf32>
    %35 = arith.mulf %33, %34 : vector<16x16xf32>
    %c15_i32 = arith.constant 15 : i32
    %36 = tpu.dynamic_rotate %0 by %c15_i32 dim 0 : vector<16x16xf32>, i32 -> vector<16x16xf32>
    %37 = vector.broadcast %28 : vector<16x1xf32> to vector<16x16xf32>
    %38 = arith.mulf %36, %37 : vector<16x16xf32>
    %39 = tpu.concatenate %35, %0, %38 in 1 : vector<16x16xf32>, vector<16x16xf32>, vector<16x16xf32> -> vector<16x48xf32>
    %cst = arith.constant dense<0.000000e+00> : vector<16x32xf32>
    %40 = tpu.matmul %39, %29, %cst {dimension_numbers = #tpu.dot_dimension_numbers<[1], [0], [0], [1], [0, 0, 1, 1], [], []>} : vector<16x48xf32>, vector<48x32xf32>, vector<16x32xf32> -> vector<16x32xf32>
    %41 = vector.broadcast %30 : vector<1x32xf32> to vector<16x32xf32>
    %42 = arith.addf %40, %41 : vector<16x32xf32>
    %cst_12 = arith.constant 0.000000e+00 : f32
    %43 = vector.broadcast %cst_12 : f32 to vector<16x32xf32>
    %44 = arith.maximumf %42, %43 : vector<16x32xf32>
    %cst_13 = arith.constant dense<0.000000e+00> : vector<16xf32>
    %45 = vector.multi_reduction <add>, %44, %cst_13 [1] : vector<16x32xf32> to vector<16xf32>
    %46 = vector.shape_cast %45 : vector<16xf32> to vector<16x1xf32>
    %cst_14 = arith.constant 3.200000e+01 : f32
    %47 = vector.broadcast %cst_14 : f32 to vector<16x1xf32>
    %48 = arith.divf %46, %47 : vector<16x1xf32>
    %49 = arith.mulf %44, %44 : vector<16x32xf32>
    %cst_15 = arith.constant dense<0.000000e+00> : vector<16xf32>
    %50 = vector.multi_reduction <add>, %49, %cst_15 [1] : vector<16x32xf32> to vector<16xf32>
    %51 = vector.shape_cast %50 : vector<16xf32> to vector<16x1xf32>
    %cst_16 = arith.constant 3.200000e+01 : f32
    %52 = vector.broadcast %cst_16 : f32 to vector<16x1xf32>
    %53 = arith.divf %51, %52 : vector<16x1xf32>
    %54 = arith.mulf %48, %48 : vector<16x1xf32>
    %55 = arith.subf %53, %54 : vector<16x1xf32>
    %cst_17 = arith.constant 0.000000e+00 : f32
    %56 = vector.broadcast %cst_17 : f32 to vector<16x1xf32>
    %57 = arith.maximumf %55, %56 : vector<16x1xf32>
    %58 = vector.broadcast %48 : vector<16x1xf32> to vector<16x32xf32>
    %59 = arith.subf %44, %58 : vector<16x32xf32>
    %cst_18 = arith.constant 9.99999996E-13 : f32
    %60 = vector.broadcast %cst_18 : f32 to vector<16x1xf32>
    %61 = arith.addf %57, %60 : vector<16x1xf32>
    %62 = math.rsqrt %61 : vector<16x1xf32>
    %63 = vector.broadcast %62 : vector<16x1xf32> to vector<16x32xf32>
    %64 = arith.mulf %59, %63 : vector<16x32xf32>
    %65 = vector.broadcast %31 : vector<1x32xf32> to vector<16x32xf32>
    %66 = arith.mulf %64, %65 : vector<16x32xf32>
    %67 = vector.broadcast %32 : vector<1x32xf32> to vector<16x32xf32>
    %68 = arith.addf %66, %67 : vector<16x32xf32>
    %69 = vector.broadcast %1 : vector<16x1xf32> to vector<16x32xf32>
    %70 = arith.mulf %68, %69 : vector<16x32xf32>
    %71 = vector.extract_strided_slice %2 {offsets = [48, 0], sizes = [96, 32], strides = [1, 1]} : vector<176x32xf32> to vector<96x32xf32>
    %72 = vector.extract_strided_slice %3 {offsets = [3, 0], sizes = [1, 32], strides = [1, 1]} : vector<7x32xf32> to vector<1x32xf32>
    %73 = vector.extract_strided_slice %3 {offsets = [4, 0], sizes = [1, 32], strides = [1, 1]} : vector<7x32xf32> to vector<1x32xf32>
    %74 = vector.extract_strided_slice %3 {offsets = [5, 0], sizes = [1, 32], strides = [1, 1]} : vector<7x32xf32> to vector<1x32xf32>
    %c1_i32_19 = arith.constant 1 : i32
    %75 = tpu.dynamic_rotate %70 by %c1_i32_19 dim 0 : vector<16x32xf32>, i32 -> vector<16x32xf32>
    %76 = vector.broadcast %24 : vector<16x1xf32> to vector<16x32xf32>
    %77 = arith.mulf %75, %76 : vector<16x32xf32>
    %c15_i32_20 = arith.constant 15 : i32
    %78 = tpu.dynamic_rotate %70 by %c15_i32_20 dim 0 : vector<16x32xf32>, i32 -> vector<16x32xf32>
    %79 = vector.broadcast %28 : vector<16x1xf32> to vector<16x32xf32>
    %80 = arith.mulf %78, %79 : vector<16x32xf32>
    %81 = tpu.concatenate %77, %70, %80 in 1 : vector<16x32xf32>, vector<16x32xf32>, vector<16x32xf32> -> vector<16x96xf32>
    %cst_21 = arith.constant dense<0.000000e+00> : vector<16x32xf32>
    %82 = tpu.matmul %81, %71, %cst_21 {dimension_numbers = #tpu.dot_dimension_numbers<[1], [0], [0], [1], [0, 0, 1, 1], [], []>} : vector<16x96xf32>, vector<96x32xf32>, vector<16x32xf32> -> vector<16x32xf32>
    %83 = vector.broadcast %72 : vector<1x32xf32> to vector<16x32xf32>
    %84 = arith.addf %82, %83 : vector<16x32xf32>
    %cst_22 = arith.constant 0.000000e+00 : f32
    %85 = vector.broadcast %cst_22 : f32 to vector<16x32xf32>
    %86 = arith.maximumf %84, %85 : vector<16x32xf32>
    %cst_23 = arith.constant dense<0.000000e+00> : vector<16xf32>
    %87 = vector.multi_reduction <add>, %86, %cst_23 [1] : vector<16x32xf32> to vector<16xf32>
    %88 = vector.shape_cast %87 : vector<16xf32> to vector<16x1xf32>
    %cst_24 = arith.constant 3.200000e+01 : f32
    %89 = vector.broadcast %cst_24 : f32 to vector<16x1xf32>
    %90 = arith.divf %88, %89 : vector<16x1xf32>
    %91 = arith.mulf %86, %86 : vector<16x32xf32>
    %cst_25 = arith.constant dense<0.000000e+00> : vector<16xf32>
    %92 = vector.multi_reduction <add>, %91, %cst_25 [1] : vector<16x32xf32> to vector<16xf32>
    %93 = vector.shape_cast %92 : vector<16xf32> to vector<16x1xf32>
    %cst_26 = arith.constant 3.200000e+01 : f32
    %94 = vector.broadcast %cst_26 : f32 to vector<16x1xf32>
    %95 = arith.divf %93, %94 : vector<16x1xf32>
    %96 = arith.mulf %90, %90 : vector<16x1xf32>
    %97 = arith.subf %95, %96 : vector<16x1xf32>
    %cst_27 = arith.constant 0.000000e+00 : f32
    %98 = vector.broadcast %cst_27 : f32 to vector<16x1xf32>
    %99 = arith.maximumf %97, %98 : vector<16x1xf32>
    %100 = vector.broadcast %90 : vector<16x1xf32> to vector<16x32xf32>
    %101 = arith.subf %86, %100 : vector<16x32xf32>
    %cst_28 = arith.constant 9.99999996E-13 : f32
    %102 = vector.broadcast %cst_28 : f32 to vector<16x1xf32>
    %103 = arith.addf %99, %102 : vector<16x1xf32>
    %104 = math.rsqrt %103 : vector<16x1xf32>
    %105 = vector.broadcast %104 : vector<16x1xf32> to vector<16x32xf32>
    %106 = arith.mulf %101, %105 : vector<16x32xf32>
    %107 = vector.broadcast %73 : vector<1x32xf32> to vector<16x32xf32>
    %108 = arith.mulf %106, %107 : vector<16x32xf32>
    %109 = vector.broadcast %74 : vector<1x32xf32> to vector<16x32xf32>
    %110 = arith.addf %108, %109 : vector<16x32xf32>
    %111 = vector.broadcast %1 : vector<16x1xf32> to vector<16x32xf32>
    %112 = arith.mulf %110, %111 : vector<16x32xf32>
    %113 = vector.extract_strided_slice %2 {offsets = [144, 0], sizes = [32, 32], strides = [1, 1]} : vector<176x32xf32> to vector<32x32xf32>
    %cst_29 = arith.constant dense<0.000000e+00> : vector<16x32xf32>
    %114 = tpu.matmul %112, %113, %cst_29 {dimension_numbers = #tpu.dot_dimension_numbers<[1], [0], [0], [1], [0, 0, 1, 1], [], []>} : vector<16x32xf32>, vector<32x32xf32>, vector<16x32xf32> -> vector<16x32xf32>
    %115 = vector.extract_strided_slice %3 {offsets = [6, 0], sizes = [1, 32], strides = [1, 1]} : vector<7x32xf32> to vector<1x32xf32>
    %116 = vector.broadcast %115 : vector<1x32xf32> to vector<16x32xf32>
    %117 = arith.addf %114, %116 : vector<16x32xf32>
    %118 = vector.broadcast %1 : vector<16x1xf32> to vector<16x32xf32>
    %119 = arith.mulf %117, %118 : vector<16x32xf32>
    %120 = vector.extract_strided_slice %119 {offsets = [0, 0], sizes = [16, 2], strides = [1, 1]} : vector<16x32xf32> to vector<16x2xf32>
    %c0_30 = arith.constant 0 : index
    %c0_31 = arith.constant 0 : index
    %121 = vector.load %arg4[%c0_30, %c0_31] : memref<16x2xf32, #tpu.memory_space<vmem>>, vector<16x2xf32>
    tpu.vector_store %arg4[%c0_30, %c0_31], %120 {strides = array<i32>} : memref<16x2xf32, #tpu.memory_space<vmem>>, vector<16x2xf32>,
    return
  }
}

</mosaic_0001>

<bundles_post_ra>
// kernel: tpu_custom_call.1
= control target key start
LH: loop header
LB: loop body
LE: loop exit
PB: predicated region body
PF: predicated region fallthrough
CT: control target
= control target key end

     0   :  { %v44_v0 = vlaneseq  ;;  %s631_s21 = smov 16   ;;  %v632_v19 = vmov 0.0   ;;  %s633_s5 = smov 32   ;;  %vm113_vm6 = vcmask 130048   ;;  %vm116_vm7 = vcmask 261120   ;;  %s836_s0 = inlined_call_operand.vmem [shape: f32[16,16], index: 0, kind: input, shape index: {}]   ;;  %s837_s2 = inlined_call_operand.vmem [shape: f32[176,32], index: 2, kind: input, shape index: {}]   ;;  %s838_s3 = inlined_call_operand.vmem [shape: f32[7,32], index: 3, kind: input, shape index: {}]   ;;  %s839_s1 = inlined_call_operand.vmem [shape: f32[16,1], index: 1, kind: input, shape index: {}]   ;;  %s840_s4 = inlined_call_operand.vmem [shape: f32[16,2], index: 4, kind: output, shape index: {}]  }
   0x1   :  { %v17_v1 = vld [vmem:[%s836_s0] sm:$0xff]  ;;  %v18_v2 = vld [vmem:[%s836_s0 + $0x8] sm:$0xff]  ;;  %v24_v10 = vld [vmem:[%s837_s2 + $0x18] sm:$0xff]  ;;  %vm123_vm8 = vcmask 392192   ;;  %v634_v38 = vmov 0   ;;  %vm294_vm9 = vcmask 523264  }
   0x2   :  { %v26_v3 = vld [vmem:[%s837_s2 + $0x28] sm:$0xff]  ;;  %v84_v4 = vrot.slane %v18_v2, 7  ;;  %v91_v5 = vrot.slane %v18_v2, 1  ;;  %99 = vrot.lane.b32.xlu0 %v17_v1, %s631_s21  ;;  %v83_v6 = vrot.slane %v17_v1, 7  ;;  %v90_v7 = vrot.slane %v17_v1, 1  ;;  %v25_v8 = vld [vmem:[%s837_s2 + $0x20] sm:$0xff]  ;;  %621 = vset.pattern.permute.xlu1 %v634_v38 }
   0x3   :  { %563 = vmatprep.subr.mxu0 %v26_v3  ;;  %v673_v9 = vshrl.u32 %v44_v0, 7  ;;  %v23_v13 = vld [vmem:[%s837_s2 + $0x10] sm:$0xff]  ;;  %v22_v17 = vld [vmem:[%s837_s2 + $0x8] sm:$0xff]  ;;  %v21_v24 = vld [vmem:[%s837_s2] sm:$0xff]  ;;  %622 = vset.pattern.permute.xlu0 %v634_v38  ;;  %vm301_vm10 = vcmask 785408   ;;  %vm518_vm11 = vcmask 15360  }
   0x4   :  { %564 = vmatpush3.msra.mxu0 %v26_v3  ;;  %v719_v40 = vld [vmem:[%s838_s3] sm:$0x7f]  ;;  %v20_v55 = vld [vmem:[%s839_s1 + $0x8] sm:$0xff]  ;;  %v36_v58 = vld [vmem:[%s837_s2 + $0x78] sm:$0xff]  ;;  %s635_s3 = smov 64  }
   0x5   :  { %565 = vmatprep.subr.mxu0 %v25_v8  ;;  %v51_v11 = vand.u32 7, %v673_v9  ;;  %vm92_vm0 = vcmp.lt.s32.totalorder %v673_v9, 7  ;;  %v46_v12 = vadd.s32 8, %v673_v9  ;;  %vm85_vm1 = vcmp.lt.s32.totalorder %v673_v9, 1  ;;  %v19_v54 = vld [vmem:[%s839_s1] sm:$0xff]  ;;  %v38_v56 = vld [vmem:[%s837_s2 + $0x88] sm:$0xff] }
   0x6   :  { %566 = vmatpush3.msra.mxu0 %v25_v8  ;;  %v93_v14 = vsel %vm92_vm0, %v90_v7, %v91_v5  ;;  %101 = vrot.lane.b32.xlu0 %v18_v2, %s631_s21  ;;  %v87_v15 = vsel %vm85_vm1, %v84_v4, %v83_v6  ;;  %v86_v18 = vsel %vm85_vm1, %v83_v6, %v84_v4  ;;  %v121_v39 = vsub.s32 0, %v673_v9  ;;  %v37_v57 = vld [vmem:[%s837_s2 + $0x80] sm:$0xff]  ;;  %v35_v59 = vld [vmem:[%s837_s2 + $0x70] sm:$0xff]  ;;  %v34_v60 = vld [vmem:[%s837_s2 + $0x68] sm:$0xff] }
   0x7   :  { %567 = vmatprep.subr.mxu0 %v24_v10  ;;  %vm71_vm2 = vcmp.gt.s32.totalorder %v51_v11, 0  ;;  %vm77_vm3 = vcmp.lt.s32.totalorder %v51_v11, 7  ;;  %v58_v16 = vand.u32 7, %v46_v12  ;;  %v94_v21 = vsel %vm92_vm0, %v91_v5, %v90_v7  ;;  %578 = vmatprep.subr.mxu1 %v38_v56  ;;  %v33_v61 = vld [vmem:[%s837_s2 + $0x60] sm:$0xff] }
   0x8   :  { %568 = vmatpush3.msra.mxu0 %v24_v10  ;;  %v694_v20 = vsel %vm77_vm3, 1.0, %v632_v19  ;;  %v698_v22 = vsel %vm71_vm2, 1.0, %v632_v19  ;;  %v122_v41 = vrot.slane %v719_v40, %v121_v39  ;;  %579 = vmatpush3.msra.mxu1 %v38_v56 }
   0x9   :  { %569 = vmatprep.subr.mxu0 %v23_v13  ;;  %v95_v23 = vmul.f32 %v694_v20, %v93_v14  ;;  %vm78_vm4 = vcmp.lt.s32.totalorder %v58_v16, 7  ;;  %vm72_vm5 = vcmp.gt.s32.totalorder %v58_v16, 0  ;;  %v88_v29 = vmul.f32 %v698_v22, %v87_v15  ;;  %580 = vmatprep.subr.mxu1 %v37_v57 }
   0xa   :  { %570 = vmatpush3.msra.mxu0 %v23_v13  ;;  %v704_v25 = vsel %vm78_vm4, 1.0, %v632_v19  ;;  %v706_v26 = vsel %vm72_vm5, 1.0, %v632_v19  ;;  %581 = vmatpush3.msra.mxu1 %v37_v57  ;;  %v242_v15 = vsub.s32 1, %v673_v9  ;;  %v248_v16 = vsub.s32 2, %v673_v9 }
   0xb   :  { %571 = vmatprep.subr.mxu0 %v22_v17  ;;  %107 = vrot.lane.b32.xlu1 %v95_v23, %s633_s5  ;;  %v96_v27 = vmul.f32 %v704_v25, %v94_v21  ;;  %v89_v31 = vmul.f32 %v706_v26, %v86_v18  ;;  %v32_v21 = vld [vmem:[%s837_s2 + $0x58] sm:$0xff]  ;;  %v31_v23 = vld [vmem:[%s837_s2 + $0x50] sm:$0xff] }
   0xc   :  { %572 = vmatpush3.msra.mxu0 %v22_v17  ;;  %582 = vmatprep.subr.mxu1 %v36_v58  ;;  %v243_v18 = vrot.slane %v719_v40, %v242_v15 }
   0xd   :  { %573 = vmatprep.subr.mxu0 %v21_v24  ;;  %583 = vmatpush3.msra.mxu1 %v36_v58 }
   0xe   :  { %574 = vmatpush3.msra.mxu0 %v21_v24  ;;  %584 = vmatprep.subr.mxu1 %v35_v59  ;;  %v249_v24 = vrot.slane %v719_v40, %v248_v16 }
   0xf   :  { %109 = vrot.lane.b32.xlu1 %v96_v27, %s633_s5  ;;  %585 = vmatpush3.msra.mxu1 %v35_v59 }
  0x10   :  { %586 = vmatprep.subr.mxu1 %v34_v60 }
  0x11   :  { %587 = vmatpush3.msra.mxu1 %v34_v60 }
  0x12   :  { %588 = vmatprep.subr.mxu1 %v33_v61 }
  0x13   :  { %589 = vmatpush3.msra.mxu1 %v33_v61 }
  0x14   :  { %590 = vmatprep.subr.mxu1 %v32_v21 }
  0x15   :  { %591 = vmatpush3.msra.mxu1 %v32_v21 }
  0x16   :  { %592 = vmatprep.subr.mxu1 %v31_v23 }
  0x17   :  { %593 = vmatpush3.msra.mxu1 %v31_v23 }
  0x74   :  { %v100_v28 = vpop.permute.xlu0 %99 }
  0x75   :  { %v114_v30 = vsel %vm113_vm6, %v88_v29, %v100_v28 }
  0x78   :  { %v102_v32 = vpop.permute.xlu0 %101 }
  0x79   :  { %v115_v35 = vsel %vm113_vm6, %v89_v31, %v102_v32  ;;  %v30_v31 = vld [vmem:[%s837_s2 + $0x48] sm:$0xff]  ;;  %v29_v32 = vld [vmem:[%s837_s2 + $0x40] sm:$0xff] }
  0x7a   :  { %594 = vmatprep.subr.mxu1 %v30_v31 }
  0x7b   :  { %595 = vmatpush3.msra.mxu1 %v30_v31 }
  0x7c   :  { %596 = vmatprep.subr.mxu1 %v29_v32 }
  0x7d   :  { %v108_v33 = vpop.permute.xlu1 %107  ;;  %597 = vmatpush3.msra.mxu1 %v29_v32 }
  0x7e   :  { %v117_v34 = vsel %vm116_vm7, %v114_v30, %v108_v33 }
  0x7f   :  { %575 = vmatprep.mubr.msk.f32.mxu0 %vm123_vm8, %v117_v34 }
  0x81   :  { %v110_v36 = vpop.permute.xlu1 %109 }
  0x82   :  { %v118_v37 = vsel %vm116_vm7, %v115_v35, %v110_v36 }
  0x83   :  { %576 = vmatmul.mubr.msk.f32.vlgmr.msra.gmra.mxu0 %vm123_vm8, %v118_v37  ;;  %v28_v37 = vld [vmem:[%s837_s2 + $0x38] sm:$0xff] }
  0x84   :  { %598 = vmatprep.subr.mxu1 %v28_v37 }
  0x85   :  { %599 = vmatpush3.msra.mxu1 %v28_v37  ;;  %v425_v37 = vsub.s32 5, %v673_v9 }
 0x143   :  { %v577_v42 = vpop.f32.mrf.mxu0 }
 0x144   :  { %v202_v43 = vadd.f32 %v577_v42, %v122_v41  ;;  %v27_v42 = vld [vmem:[%s837_s2 + $0x30] sm:$0xff] }
 0x145   :  { %v196_v44 = vpop.f32.mrf.mxu0  ;;  %600 = vmatprep.subr.mxu1 %v27_v42 }
 0x146   :  { %v722_v45 = vmax.f32 %v202_v43, 0.0  ;;  %v197_v46 = vadd.f32 %v196_v44, %v122_v41  ;;  %601 = vmatpush3.msra.mxu1 %v27_v42 }
 0x148   :  { %v205_v47 = vmax.f32 %v197_v46, 0.0  ;;  %v210_v48 = vsel %vm116_vm7, %v722_v45, 0.0  ;;  %v217_v52 = vmul.f32 %v722_v45, %v722_v45 }
 0x149   :  { %211 = vadd.xlane.f32.xlu1 %v210_v48 }
 0x14a   :  { %v207_v49 = vsel %vm116_vm7, %v205_v47, 0.0  ;;  %v216_v50 = vmul.f32 %v205_v47, %v205_v47  ;;  %v221_v53 = vsel %vm116_vm7, %v217_v52, 0.0 }
 0x14b   :  { %208 = vadd.xlane.f32.xlu0 %v207_v49 }
 0x14c   :  { %v218_v51 = vsel %vm116_vm7, %v216_v50, 0.0 }
 0x14f   :  { %219 = vadd.xlane.f32.xlu0 %v218_v51 }
 0x153   :  { %222 = vadd.xlane.f32.xlu0 %v221_v53 }
 0x15a   :  { %254 = vperm.xlu1 %621, %v19_v54  }
 0x169   :  { %259 = vperm.xlu0 %622, %v20_v55  }
 0x1d2   :  { %v212_v0 = vpop.xlane.xlu1 %211 }
 0x1d3   :  { %v215_v2 = vmul.f32 0.03125, %v212_v0 }
 0x1d4   :  { %v209_v62 = vpop.xlane.xlu0 %208 }
 0x1d5   :  { %v214_v63 = vmul.f32 0.03125, %v209_v62  ;;  %v227_v7 = vmul.f32 %v215_v2, %v215_v2  ;;  %v233_v28 = vsub.f32 %v722_v45, %v215_v2 }
 0x1d6   :  { %v772_v35 = vpop.permute.xlu1 %254 }
 0x1d7   :  { %v226_v3 = vmul.f32 %v214_v63, %v214_v63  ;;  %v232_v17 = vsub.f32 %v205_v47, %v214_v63 }
 0x1d8   :  { %v220_v1 = vpop.xlane.xlu0 %219 }
 0x1d9   :  { %v224_v4 = vmul.f32 0.03125, %v220_v1 }
 0x1db   :  { %v228_v5 = vsub.f32 %v224_v4, %v226_v3 }
 0x1dc   :  { %v223_v6 = vpop.xlane.xlu0 %222 }
 0x1dd   :  { %v230_v8 = vmax.f32 %v228_v5, 0.0  ;;  %v225_v10 = vmul.f32 0.03125, %v223_v6 }
 0x1df   :  { %v234_v11 = vadd.f32 1e-12, %v230_v8  ;;  %v229_v12 = vsub.f32 %v225_v10, %v227_v7 }
 0x1e1   :  { %623 = vrsqrt.f32 %v234_v11  ;;  %v231_v13 = vmax.f32 %v229_v12, 0.0  ;;  %v42_v11 = vld [vmem:[%s837_s2 + $0xa8] sm:$0xff]  ;;  %v41_v12 = vld [vmem:[%s837_s2 + $0xa0] sm:$0xff] }
 0x1e2   :  { %605 = vmatprep.subr.mxu0 %v42_v11 }
 0x1e3   :  { %v235_v14 = vadd.f32 1e-12, %v231_v13  ;;  %606 = vmatpush3.msra.mxu0 %v42_v11  ;;  %v40_v13 = vld [vmem:[%s837_s2 + $0x98] sm:$0xff] }
 0x1e4   :  { %v777_v38 = vpop.permute.xlu0 %259  ;;  %607 = vmatprep.subr.mxu0 %v41_v12 }
 0x1e5   :  { %625 = vrsqrt.f32 %v235_v14  ;;  %608 = vmatpush3.msra.mxu0 %v41_v12  ;;  %v39_v14 = vld [vmem:[%s837_s2 + $0x90] sm:$0xff] }
 0x1e6   :  { %609 = vmatprep.subr.mxu0 %v40_v13 }
 0x1e7   :  { %610 = vmatpush3.msra.mxu0 %v40_v13 }
 0x1e8   :  { %611 = vmatprep.subr.mxu0 %v39_v14 }
 0x1e9   :  { %612 = vmatpush3.msra.mxu0 %v39_v14 }
 0x1ee   :  { %v624_v19 = vpop.eup %623 }
 0x1ef   :  { %v238_v27 = vmul.f32 %v624_v19, %v232_v17 }
 0x1f1   :  { %v244_v29 = vmul.f32 %v243_v18, %v238_v27 }
 0x1f2   :  { %v626_v30 = vpop.eup %625 }
 0x1f3   :  { %v250_v33 = vadd.f32 %v249_v24, %v244_v29  ;;  %v239_v34 = vmul.f32 %v626_v30, %v233_v28 }
 0x1f5   :  { %v245_v36 = vmul.f32 %v243_v18, %v239_v34  ;;  %v262_v39 = vmul.f32 %v772_v35, %v250_v33 }
 0x1f7   :  { %v251_v41 = vadd.f32 %v249_v24, %v245_v36  ;;  %v264_v44 = vrot.slane %v262_v39, 7  ;;  %v270_v47 = vrot.slane %v262_v39, 1  ;;  %v419_v36 = vsub.s32 4, %v673_v9 }
 0x1f9   :  { %v263_v43 = vmul.f32 %v777_v38, %v251_v41  ;;  %v420_v41 = vrot.slane %v719_v40, %v419_v36 }
 0x1fb   :  { %v265_v45 = vrot.slane %v263_v43, 7  ;;  %v271_v46 = vrot.slane %v263_v43, 1  ;;  %280 = vrot.lane.b32.xlu1 %v263_v43, %s633_s5 }
 0x1fd   :  { %v266_v48 = vsel %vm85_vm1, %v264_v44, %v265_v45  ;;  %v267_v49 = vsel %vm85_vm1, %v265_v45, %v264_v44  ;;  %v272_v50 = vsel %vm92_vm0, %v270_v47, %v271_v46  ;;  %v273_v52 = vsel %vm92_vm0, %v271_v46, %v270_v47 }
 0x1fe   :  { %v274_v51 = vmul.f32 %v694_v20, %v272_v50  ;;  %v275_v53 = vmul.f32 %v704_v25, %v273_v52  ;;  %v268_v56 = vmul.f32 %v698_v22, %v267_v49  ;;  %v269_v20 = vmul.f32 %v706_v26, %v266_v48 }
 0x1ff   :  { %278 = vrot.lane.b32.xlu1 %v262_v39, %s633_s5  ;;  %v299_v25 = vsub.s32 3, %v673_v9  ;;  %v426_v44 = vrot.slane %v719_v40, %v425_v37 }
 0x201   :  { %v300_v63 = vrot.slane %v719_v40, %v299_v25 }
 0x203   :  { %286 = vrot.lane.b32.xlu1 %v274_v51, %s635_s3 }
 0x207   :  { %288 = vrot.lane.b32.xlu1 %v275_v53, %s635_s3 }
 0x26d   :  { %v281_v54 = vpop.permute.xlu1 %280 }
 0x26e   :  { %v293_v60 = vsel %vm116_vm7, %v269_v20, %v281_v54  ;;  %v433_v54 = vsub.s32 6, %v673_v9 }
 0x271   :  { %v279_v55 = vpop.permute.xlu1 %278 }
 0x272   :  { %v292_v57 = vsel %vm116_vm7, %v268_v56, %v279_v55  ;;  %v434_v55 = vrot.slane %v719_v40, %v433_v54 }
 0x275   :  { %v287_v58 = vpop.permute.xlu1 %286 }
 0x276   :  { %v295_v59 = vsel %vm294_vm9, %v292_v57, %v287_v58 }
 0x277   :  { %602 = vmatprep.mubr.msk.f32.mxu1 %vm301_vm10, %v295_v59 }
 0x279   :  { %v289_v61 = vpop.permute.xlu1 %288 }
 0x27a   :  { %v296_v62 = vsel %vm294_vm9, %v293_v60, %v289_v61 }
 0x27b   :  { %603 = vmatmul.mubr.msk.f32.vlgmr.msra.gmra.mxu1 %vm301_vm10, %v296_v62 }
 0x33b   :  { %v604_v0 = vpop.f32.mrf.mxu1 }
 0x33c   :  { %v380_v22 = vadd.f32 %v604_v0, %v300_v63 }
 0x33d   :  { %v374_v1 = vpop.f32.mrf.mxu1 }
 0x33e   :  { %v384_v2 = vmax.f32 %v380_v22, 0.0  ;;  %v375_v3 = vadd.f32 %v374_v1, %v300_v63 }
 0x340   :  { %v383_v4 = vmax.f32 %v375_v3, 0.0  ;;  %v388_v5 = vsel %vm116_vm7, %v384_v2, 0.0  ;;  %v394_v8 = vmul.f32 %v384_v2, %v384_v2 }
 0x341   :  { %389 = vadd.xlane.f32.xlu0 %v388_v5 }
 0x342   :  { %v385_v26 = vsel %vm116_vm7, %v383_v4, 0.0  ;;  %v393_v6 = vmul.f32 %v383_v4, %v383_v4  ;;  %v398_v10 = vsel %vm116_vm7, %v394_v8, 0.0 }
 0x343   :  { %386 = vadd.xlane.f32.xlu1 %v385_v26 }
 0x344   :  { %v395_v7 = vsel %vm116_vm7, %v393_v6, 0.0 }
 0x347   :  { %396 = vadd.xlane.f32.xlu1 %v395_v7 }
 0x34b   :  { %399 = vadd.xlane.f32.xlu1 %v398_v10 }
 0x3ca   :  { %v390_v17 = vpop.xlane.xlu0 %389 }
 0x3cb   :  { %v392_v19 = vmul.f32 0.03125, %v390_v17 }
 0x3cc   :  { %v387_v15 = vpop.xlane.xlu1 %386 }
 0x3cd   :  { %v391_v16 = vmul.f32 0.03125, %v387_v15  ;;  %v404_v28 = vmul.f32 %v392_v19, %v392_v19  ;;  %v410_v45 = vsub.f32 %v384_v2, %v392_v19 }
 0x3cf   :  { %v403_v21 = vmul.f32 %v391_v16, %v391_v16  ;;  %v409_v39 = vsub.f32 %v383_v4, %v391_v16 }
 0x3d0   :  { %v397_v18 = vpop.xlane.xlu1 %396 }
 0x3d1   :  { %v401_v23 = vmul.f32 0.03125, %v397_v18 }
 0x3d3   :  { %v405_v24 = vsub.f32 %v401_v23, %v403_v21 }
 0x3d4   :  { %v400_v27 = vpop.xlane.xlu1 %399 }
 0x3d5   :  { %v407_v29 = vmax.f32 %v405_v24, 0.0  ;;  %v402_v30 = vmul.f32 0.03125, %v400_v27 }
 0x3d7   :  { %v411_v31 = vadd.f32 1e-12, %v407_v29  ;;  %v406_v32 = vsub.f32 %v402_v30, %v404_v28 }
 0x3d9   :  { %627 = vrsqrt.f32 %v411_v31  ;;  %v408_v33 = vmax.f32 %v406_v32, 0.0 }
 0x3db   :  { %v412_v34 = vadd.f32 1e-12, %v408_v33 }
 0x3dd   :  { %629 = vrsqrt.f32 %v412_v34 }
 0x3e6   :  { %v628_v42 = vpop.eup %627 }
 0x3e7   :  { %v415_v43 = vmul.f32 %v628_v42, %v409_v39 }
 0x3e9   :  { %v421_v46 = vmul.f32 %v420_v41, %v415_v43 }
 0x3ea   :  { %v630_v47 = vpop.eup %629 }
 0x3eb   :  { %v416_v48 = vmul.f32 %v630_v47, %v410_v45  ;;  %v427_v49 = vadd.f32 %v426_v44, %v421_v46 }
 0x3ed   :  { %v422_v50 = vmul.f32 %v420_v41, %v416_v48  ;;  %v429_v51 = vmul.f32 %v427_v49, %v772_v35 }
 0x3ef   :  { %v428_v52 = vadd.f32 %v426_v44, %v422_v50  ;;  %613 = vmatprep.mubr.msk.f32.mxu0 %vm116_vm7, %v429_v51 }
 0x3f1   :  { %v430_v53 = vmul.f32 %v428_v52, %v777_v38 }
 0x3f3   :  { %614 = vmatmul.mubr.msk.f32.vlgmr.msra.gmra.mxu0 %vm116_vm7, %v430_v53 }
 0x4b3   :  { %v615_v56 = vpop.f32.mrf.mxu0 }
 0x4b4   :  { %v513_v57 = vadd.f32 %v615_v56, %v434_v55 }
 0x4b5   :  { %v507_v58 = vpop.f32.mrf.mxu0 }
 0x4b6   :  { %v517_v59 = vmul.f32 %v513_v57, %v777_v38  ;;  %v508_v20 = vadd.f32 %v507_v58, %v434_v55 }
 0x4b8   :  { %520 = vst.msk [vmem:[%s840_s4 + $0x8] sm:$0xff] %vm518_vm11, %v517_v59  ;;  %v516_v60 = vmul.f32 %v508_v20, %v772_v35 }
 0x4ba   :  { %519 = vst.msk [vmem:[%s840_s4] sm:$0xff] %vm518_vm11, %v516_v60 }

</bundles_post_ra>
